<compile_context>
chip_gen: v5e
topology: v5e:2x2
jax: 0.10.0
libtpu: 0.0.40
codegen_flags: <defaults>
</compile_context>

<pallas_src>
import functools

import jax
import jax.numpy as jnp
from jax.experimental import pallas as pl
from jax.experimental.pallas import tpu as pltpu

STATE_DIM = 3         # Pendulum-v0 observation_space.shape[0]
ACTION_DIM = 1        # Pendulum-v0 action_space.shape[0]
H1 = STATE_DIM * 32   # 96
H2 = ACTION_DIM * 48  # 48
LN_EPS = 1e-5         # torch.nn.LayerNorm default


def _round_up(n, m):
    return ((n + m - 1) // m) * m


def _layernorm_f(h, gamma, beta):
    """LayerNorm over the feature axis (axis 0; features on sublanes).

    Fused single pass: biased variance via E[h^2] - E[h]^2 (matches PyTorch's
    biased variance; eps inside the rsqrt).
    h: [F, TB], gamma/beta: [F, 1].
    """
    inv_n = 1.0 / h.shape[0]
    mu = jnp.sum(h, axis=0, keepdims=True) * inv_n            # [1, TB]
    ex2 = jnp.sum(h * h, axis=0, keepdims=True) * inv_n       # [1, TB]
    var = ex2 - mu * mu
    return (h - mu) * jax.lax.rsqrt(var + LN_EPS) * gamma + beta


def actor_kernel(x_ref, p1_ref, w2_ref, v2_ref, p3_ref, out_ref):
    # x_ref : [STATE_DIM, TB]        (batch on lanes)
    # p1_ref: [H1, STATE_DIM + 3]    (W1 | b1 | gamma1 | beta1)
    # w2_ref: [H2, H1]               (PyTorch-layout weight)
    # v2_ref: [H2, 3]                (b2 | gamma2 | beta2)
    # p3_ref: [H2 + 1, 1]            (w3 column ; b3)
    # out_ref: [ACTION_DIM, TB]
    x = x_ref[...]
    p1 = p1_ref[...]

    # ---- layer 1: Linear(3 -> 96) on the VPU (K=3 is too shallow for MXU) ----
    h = p1[:, STATE_DIM:STATE_DIM + 1]                        # bias, [H1, 1]
    for k in range(STATE_DIM):
        h = h + p1[:, k:k + 1] * x[k:k + 1, :]                # [H1, TB]
    h = _layernorm_f(h,
                     p1[:, STATE_DIM + 1:STATE_DIM + 2],
                     p1[:, STATE_DIM + 2:STATE_DIM + 3])
    h = jnp.maximum(h, 0.0)

    # ---- layer 2: Linear(96 -> 48) on the MXU (N = TB lane-dense) ----
    v2 = v2_ref[...]
    h = jnp.dot(w2_ref[...], h, preferred_element_type=jnp.float32)
    h = h + v2[:, 0:1]
    h = _layernorm_f(h, v2[:, 1:2], v2[:, 2:3])
    h = jnp.maximum(h, 0.0)

    # ---- layer 3: Linear(48 -> 1) as broadcast-mul + sublane reduce ----
    p3 = p3_ref[...]
    o = jnp.sum(p3[0:H2, :] * h, axis=0, keepdims=True)       # [1, TB]
    o = o + p3[H2:H2 + 1, :]
    out_ref[...] = jnp.tanh(o)


@functools.partial(jax.jit, static_argnames=("block_b",))
def actor_forward(x, params, block_b=1024):
    """x: [B, STATE_DIM] float32 -> [B, ACTION_DIM] float32."""
    (w1, b1, g1, be1, w2, b2, g2, be2, w3, b3) = params
    B = x.shape[0]

    # Batch tile lives on the lane axis -> must be a multiple of 128.
    block_b = _round_up(block_b, 128)
    TB = min(block_b, _round_up(B, 128))
    B_pad = _round_up(B, TB)
    grid = (B_pad // TB,)

    # Batch on lanes inside the kernel: x_t is [STATE_DIM, B_pad].
    x_t = jnp.pad(x, ((0, B_pad - B), (0, 0))).T

    # Pack the 10 parameter tensors into 4 small VMEM-resident blocks.
    # (In a real deployment these would be packed once, not per call.)
    p1 = jnp.concatenate([w1, b1[:, None], g1[:, None], be1[:, None]], axis=1)  # [H1, 6]
    v2 = jnp.stack([b2, g2, be2], axis=1)                                        # [H2, 3]
    p3 = jnp.concatenate([w3.reshape(H2, 1), b3.reshape(1, 1)], axis=0)          # [H2+1, 1]

    out_t = pl.pallas_call(
        actor_kernel,
        out_shape=jax.ShapeDtypeStruct((ACTION_DIM, B_pad), jnp.float32),
        grid=grid,
        in_specs=[
            pl.BlockSpec((STATE_DIM, TB), lambda i: (0, i)),   # streamed per tile
            pl.BlockSpec(p1.shape, lambda i: (0, 0)),          # VMEM-resident params
            pl.BlockSpec(w2.shape, lambda i: (0, 0)),
            pl.BlockSpec(v2.shape, lambda i: (0, 0)),
            pl.BlockSpec(p3.shape, lambda i: (0, 0)),
        ],
        out_specs=pl.BlockSpec((ACTION_DIM, TB), lambda i: (0, i)),
        compiler_params=pltpu.CompilerParams(
            dimension_semantics=("parallel",)),
    )(x_t, p1, w2, v2, p3)

    return out_t[0, :B].reshape(B, ACTION_DIM)


def make_params(key):
    """Deterministic synthetic parameters, PyTorch layouts ([out, in] weights)."""
    ks = jax.random.split(key, 10)

    def lin(kw, kb, fan_in, fan_out):
        bound = 1.0 / jnp.sqrt(jnp.float32(fan_in))
        w = jax.random.uniform(kw, (fan_out, fan_in), jnp.float32, -bound, bound)
        b = jax.random.uniform(kb, (fan_out,), jnp.float32, -bound, bound)
        return w, b

    w1, b1 = lin(ks[0], ks[1], STATE_DIM, H1)
    w2, b2 = lin(ks[2], ks[3], H1, H2)
    w3, b3 = lin(ks[4], ks[5], H2, ACTION_DIM)

    # LayerNorm affine params (randomized so the affine path is exercised;
    # PyTorch's default init would be gamma=1, beta=0).
    g1 = 1.0 + 0.1 * jax.random.normal(ks[6], (H1,), jnp.float32)
    be1 = 0.1 * jax.random.normal(ks[7], (H1,), jnp.float32)
    g2 = 1.0 + 0.1 * jax.random.normal(ks[8], (H2,), jnp.float32)
    be2 = 0.1 * jax.random.normal(ks[9], (H2,), jnp.float32)

    return (w1, b1, g1, be1, w2, b2, g2, be2, w3, b3)


def actor_ref(x, params):
    """Pure-JAX reference of the same forward (row-major, two-pass LN)."""
    (w1, b1, g1, be1, w2, b2, g2, be2, w3, b3) = params

    def ln(h, g, bt):
        mu = jnp.mean(h, axis=-1, keepdims=True)
        var = jnp.mean((h - mu) ** 2, axis=-1, keepdims=True)
        return (h - mu) * jax.lax.rsqrt(var + LN_EPS) * g + bt

    h = jnp.maximum(ln(x @ w1.T + b1, g1, be1), 0.0)
    h = jnp.maximum(ln(h @ w2.T + b2, g2, be2), 0.0)
    return jnp.tanh(h @ w3.T + b3)


if __name__ == "__main__":
    key = jax.random.PRNGKey(0)
    k_x, k_p = jax.random.split(key)

    B = 8
    x = jax.random.normal(k_x, (B, STATE_DIM), jnp.float32)
    params = make_params(k_p)

    out = jax.block_until_ready(actor_forward(x, params))
    ref = actor_ref(x, params)

    assert out.shape == (B, ACTION_DIM)
    assert jnp.allclose(out, ref, atol=1e-4, rtol=1e-4), \
        float(jnp.max(jnp.abs(out - ref)))

    print("KERNEL_OK")
</pallas_src>

<mosaic_0001>
module attributes {stable_mosaic.version = 11 : i64} {
  func.func @actor_kernel(%arg0: i32, %arg1: memref<3x128xf32, #tpu.memory_space<vmem>>, %arg2: memref<96x6xf32, #tpu.memory_space<vmem>>, %arg3: memref<48x96xf32, #tpu.memory_space<vmem>>, %arg4: memref<48x3xf32, #tpu.memory_space<vmem>>, %arg5: memref<49x1xf32, #tpu.memory_space<vmem>>, %arg6: memref<1x128xf32, #tpu.memory_space<vmem>>) attributes {dimension_semantics = [#tpu.dimension_semantics<parallel>], iteration_bounds = array<i64: 1>, scalar_prefetch = 0 : i64, scratch_operands = 0 : i64, tpu.core_type = #tpu.core_type<tc>, window_params = [{transform_indices = @transform_0, window_bounds = array<i64: 3, 128>}, {pipeline_mode = #tpu.pipeline_mode<synchronous>, transform_indices = @transform_1, window_bounds = array<i64: 96, 6>}, {pipeline_mode = #tpu.pipeline_mode<synchronous>, transform_indices = @transform_2, window_bounds = array<i64: 48, 96>}, {pipeline_mode = #tpu.pipeline_mode<synchronous>, transform_indices = @transform_3, window_bounds = array<i64: 48, 3>}, {pipeline_mode = #tpu.pipeline_mode<synchronous>, transform_indices = @transform_4, window_bounds = array<i64: 49, 1>}, {transform_indices = @transform_5, window_bounds = array<i64: 1, 128>}]} {
    %c0 = arith.constant 0 : index
    %c0_0 = arith.constant 0 : index
    %0 = vector.load %arg1[%c0, %c0_0] : memref<3x128xf32, #tpu.memory_space<vmem>>, vector<3x128xf32>
    %c0_1 = arith.constant 0 : index
    %c0_2 = arith.constant 0 : index
    %1 = vector.load %arg2[%c0_1, %c0_2] : memref<96x6xf32, #tpu.memory_space<vmem>>, vector<96x6xf32>
    %2 = vector.extract_strided_slice %1 {offsets = [0, 3], sizes = [96, 1], strides = [1, 1]} : vector<96x6xf32> to vector<96x1xf32>
    %3 = vector.extract_strided_slice %1 {offsets = [0, 0], sizes = [96, 1], strides = [1, 1]} : vector<96x6xf32> to vector<96x1xf32>
    %4 = vector.extract_strided_slice %0 {offsets = [0, 0], sizes = [1, 128], strides = [1, 1]} : vector<3x128xf32> to vector<1x128xf32>
    %5 = vector.broadcast %3 : vector<96x1xf32> to vector<96x128xf32>
    %6 = vector.broadcast %4 : vector<1x128xf32> to vector<96x128xf32>
    %7 = arith.mulf %5, %6 : vector<96x128xf32>
    %8 = vector.broadcast %2 : vector<96x1xf32> to vector<96x128xf32>
    %9 = arith.addf %8, %7 : vector<96x128xf32>
    %10 = vector.extract_strided_slice %1 {offsets = [0, 1], sizes = [96, 1], strides = [1, 1]} : vector<96x6xf32> to vector<96x1xf32>
    %11 = vector.extract_strided_slice %0 {offsets = [1, 0], sizes = [1, 128], strides = [1, 1]} : vector<3x128xf32> to vector<1x128xf32>
    %12 = vector.broadcast %10 : vector<96x1xf32> to vector<96x128xf32>
    %13 = vector.broadcast %11 : vector<1x128xf32> to vector<96x128xf32>
    %14 = arith.mulf %12, %13 : vector<96x128xf32>
    %15 = arith.addf %9, %14 : vector<96x128xf32>
    %16 = vector.extract_strided_slice %1 {offsets = [0, 2], sizes = [96, 1], strides = [1, 1]} : vector<96x6xf32> to vector<96x1xf32>
    %17 = vector.extract_strided_slice %0 {offsets = [2, 0], sizes = [1, 128], strides = [1, 1]} : vector<3x128xf32> to vector<1x128xf32>
    %18 = vector.broadcast %16 : vector<96x1xf32> to vector<96x128xf32>
    %19 = vector.broadcast %17 : vector<1x128xf32> to vector<96x128xf32>
    %20 = arith.mulf %18, %19 : vector<96x128xf32>
    %21 = arith.addf %15, %20 : vector<96x128xf32>
    %22 = vector.extract_strided_slice %1 {offsets = [0, 4], sizes = [96, 1], strides = [1, 1]} : vector<96x6xf32> to vector<96x1xf32>
    %23 = vector.extract_strided_slice %1 {offsets = [0, 5], sizes = [96, 1], strides = [1, 1]} : vector<96x6xf32> to vector<96x1xf32>
    %cst = arith.constant dense<0.000000e+00> : vector<128xf32>
    %24 = vector.multi_reduction <add>, %21, %cst [0] : vector<96x128xf32> to vector<128xf32>
    %25 = vector.shape_cast %24 : vector<128xf32> to vector<1x128xf32>
    %cst_3 = arith.constant 0.010416667 : f32
    %26 = vector.broadcast %cst_3 : f32 to vector<1x128xf32>
    %27 = arith.mulf %25, %26 : vector<1x128xf32>
    %28 = arith.mulf %21, %21 : vector<96x128xf32>
    %cst_4 = arith.constant dense<0.000000e+00> : vector<128xf32>
    %29 = vector.multi_reduction <add>, %28, %cst_4 [0] : vector<96x128xf32> to vector<128xf32>
    %30 = vector.shape_cast %29 : vector<128xf32> to vector<1x128xf32>
    %cst_5 = arith.constant 0.010416667 : f32
    %31 = vector.broadcast %cst_5 : f32 to vector<1x128xf32>
    %32 = arith.mulf %30, %31 : vector<1x128xf32>
    %33 = arith.mulf %27, %27 : vector<1x128xf32>
    %34 = arith.subf %32, %33 : vector<1x128xf32>
    %35 = vector.broadcast %27 : vector<1x128xf32> to vector<96x128xf32>
    %36 = arith.subf %21, %35 : vector<96x128xf32>
    %cst_6 = arith.constant 9.99999974E-6 : f32
    %37 = vector.broadcast %cst_6 : f32 to vector<1x128xf32>
    %38 = arith.addf %34, %37 : vector<1x128xf32>
    %39 = math.rsqrt %38 : vector<1x128xf32>
    %40 = vector.broadcast %39 : vector<1x128xf32> to vector<96x128xf32>
    %41 = arith.mulf %36, %40 : vector<96x128xf32>
    %42 = vector.broadcast %22 : vector<96x1xf32> to vector<96x128xf32>
    %43 = arith.mulf %41, %42 : vector<96x128xf32>
    %44 = vector.broadcast %23 : vector<96x1xf32> to vector<96x128xf32>
    %45 = arith.addf %43, %44 : vector<96x128xf32>
    %cst_7 = arith.constant 0.000000e+00 : f32
    %46 = vector.broadcast %cst_7 : f32 to vector<96x128xf32>
    %47 = arith.maximumf %45, %46 : vector<96x128xf32>
    %c0_8 = arith.constant 0 : index
    %c0_9 = arith.constant 0 : index
    %48 = vector.load %arg4[%c0_8, %c0_9] : memref<48x3xf32, #tpu.memory_space<vmem>>, vector<48x3xf32>
    %c0_10 = arith.constant 0 : index
    %c0_11 = arith.constant 0 : index
    %49 = vector.load %arg3[%c0_10, %c0_11] : memref<48x96xf32, #tpu.memory_space<vmem>>, vector<48x96xf32>
    %cst_12 = arith.constant dense<0.000000e+00> : vector<48x128xf32>
    %50 = tpu.matmul %49, %47, %cst_12 {dimension_numbers = #tpu.dot_dimension_numbers<[1], [0], [0], [1], [0, 0, 1, 1], [], []>} : vector<48x96xf32>, vector<96x128xf32>, vector<48x128xf32> -> vector<48x128xf32>
    %51 = vector.extract_strided_slice %48 {offsets = [0, 0], sizes = [48, 1], strides = [1, 1]} : vector<48x3xf32> to vector<48x1xf32>
    %52 = vector.broadcast %51 : vector<48x1xf32> to vector<48x128xf32>
    %53 = arith.addf %50, %52 : vector<48x128xf32>
    %54 = vector.extract_strided_slice %48 {offsets = [0, 1], sizes = [48, 1], strides = [1, 1]} : vector<48x3xf32> to vector<48x1xf32>
    %55 = vector.extract_strided_slice %48 {offsets = [0, 2], sizes = [48, 1], strides = [1, 1]} : vector<48x3xf32> to vector<48x1xf32>
    %cst_13 = arith.constant dense<0.000000e+00> : vector<128xf32>
    %56 = vector.multi_reduction <add>, %53, %cst_13 [0] : vector<48x128xf32> to vector<128xf32>
    %57 = vector.shape_cast %56 : vector<128xf32> to vector<1x128xf32>
    %cst_14 = arith.constant 0.020833334 : f32
    %58 = vector.broadcast %cst_14 : f32 to vector<1x128xf32>
    %59 = arith.mulf %57, %58 : vector<1x128xf32>
    %60 = arith.mulf %53, %53 : vector<48x128xf32>
    %cst_15 = arith.constant dense<0.000000e+00> : vector<128xf32>
    %61 = vector.multi_reduction <add>, %60, %cst_15 [0] : vector<48x128xf32> to vector<128xf32>
    %62 = vector.shape_cast %61 : vector<128xf32> to vector<1x128xf32>
    %cst_16 = arith.constant 0.020833334 : f32
    %63 = vector.broadcast %cst_16 : f32 to vector<1x128xf32>
    %64 = arith.mulf %62, %63 : vector<1x128xf32>
    %65 = arith.mulf %59, %59 : vector<1x128xf32>
    %66 = arith.subf %64, %65 : vector<1x128xf32>
    %67 = vector.broadcast %59 : vector<1x128xf32> to vector<48x128xf32>
    %68 = arith.subf %53, %67 : vector<48x128xf32>
    %cst_17 = arith.constant 9.99999974E-6 : f32
    %69 = vector.broadcast %cst_17 : f32 to vector<1x128xf32>
    %70 = arith.addf %66, %69 : vector<1x128xf32>
    %71 = math.rsqrt %70 : vector<1x128xf32>
    %72 = vector.broadcast %71 : vector<1x128xf32> to vector<48x128xf32>
    %73 = arith.mulf %68, %72 : vector<48x128xf32>
    %74 = vector.broadcast %54 : vector<48x1xf32> to vector<48x128xf32>
    %75 = arith.mulf %73, %74 : vector<48x128xf32>
    %76 = vector.broadcast %55 : vector<48x1xf32> to vector<48x128xf32>
    %77 = arith.addf %75, %76 : vector<48x128xf32>
    %cst_18 = arith.constant 0.000000e+00 : f32
    %78 = vector.broadcast %cst_18 : f32 to vector<48x128xf32>
    %79 = arith.maximumf %77, %78 : vector<48x128xf32>
    %c0_19 = arith.constant 0 : index
    %c0_20 = arith.constant 0 : index
    %80 = vector.load %arg5[%c0_19, %c0_20] : memref<49x1xf32, #tpu.memory_space<vmem>>, vector<49x1xf32>
    %81 = vector.extract_strided_slice %80 {offsets = [0, 0], sizes = [48, 1], strides = [1, 1]} : vector<49x1xf32> to vector<48x1xf32>
    %82 = vector.broadcast %81 : vector<48x1xf32> to vector<48x128xf32>
    %83 = arith.mulf %82, %79 : vector<48x128xf32>
    %cst_21 = arith.constant dense<0.000000e+00> : vector<128xf32>
    %84 = vector.multi_reduction <add>, %83, %cst_21 [0] : vector<48x128xf32> to vector<128xf32>
    %85 = vector.shape_cast %84 : vector<128xf32> to vector<1x128xf32>
    %86 = vector.extract_strided_slice %80 {offsets = [48, 0], sizes = [1, 1], strides = [1, 1]} : vector<49x1xf32> to vector<1x1xf32>
    %87 = vector.broadcast %86 : vector<1x1xf32> to vector<1x128xf32>
    %88 = arith.addf %85, %87 : vector<1x128xf32>
    %89 = math.tanh %88 : vector<1x128xf32>
    %c0_22 = arith.constant 0 : index
    %c0_23 = arith.constant 0 : index
    %90 = vector.load %arg6[%c0_22, %c0_23] : memref<1x128xf32, #tpu.memory_space<vmem>>, vector<1x128xf32>
    tpu.vector_store %arg6[%c0_22, %c0_23], %89 {strides = array<i32>} : memref<1x128xf32, #tpu.memory_space<vmem>>, vector<1x128xf32>,
    return
  }
  func.func @transform_0(%arg0: i32) -> (i32, i32) {
    %c0_i32 = arith.constant 0 : i32
    %c0_i32_0 = arith.constant 0 : i32
    return %c0_i32, %arg0 : i32, i32
  }
  func.func @transform_1(%arg0: i32) -> (i32, i32) {
    %c0_i32 = arith.constant 0 : i32
    %c0_i32_0 = arith.constant 0 : i32
    %c0_i32_1 = arith.constant 0 : i32
    return %c0_i32, %c0_i32_0 : i32, i32
  }
  func.func @transform_2(%arg0: i32) -> (i32, i32) {
    %c0_i32 = arith.constant 0 : i32
    %c0_i32_0 = arith.constant 0 : i32
    %c0_i32_1 = arith.constant 0 : i32
    return %c0_i32, %c0_i32_0 : i32, i32
  }
  func.func @transform_3(%arg0: i32) -> (i32, i32) {
    %c0_i32 = arith.constant 0 : i32
    %c0_i32_0 = arith.constant 0 : i32
    %c0_i32_1 = arith.constant 0 : i32
    return %c0_i32, %c0_i32_0 : i32, i32
  }
  func.func @transform_4(%arg0: i32) -> (i32, i32) {
    %c0_i32 = arith.constant 0 : i32
    %c0_i32_0 = arith.constant 0 : i32
    %c0_i32_1 = arith.constant 0 : i32
    return %c0_i32, %c0_i32_0 : i32, i32
  }
  func.func @transform_5(%arg0: i32) -> (i32, i32) {
    %c0_i32 = arith.constant 0 : i32
    %c0_i32_0 = arith.constant 0 : i32
    return %c0_i32, %arg0 : i32, i32
  }
}

</mosaic_0001>

<bundles_post_ra>
// kernel: actor_forward.1
= control target key start
LH: loop header
LB: loop body
LE: loop exit
PB: predicated region body
PF: predicated region fallthrough
CT: control target
= control target key end

     0   :  { %v902_v0 = vmov 0   ;;  %v903_v13 = vmov 3   ;;  %v904_v14 = vmov 1   ;;  %v905_v16 = vmov 2   ;;  %s1415_s1 = inlined_call_operand.vmem [shape: f32[96,6], index: 1, kind: input, shape index: {}]   ;;  %s1416_s0 = inlined_call_operand.vmem [shape: f32[3,128], index: 0, kind: input, shape index: {}]   ;;  %s1417_s3 = inlined_call_operand.vmem [shape: f32[48,3], index: 3, kind: input, shape index: {}]   ;;  %s1418_s2 = inlined_call_operand.vmem [shape: f32[48,96], index: 2, kind: input, shape index: {}]   ;;  %s1419_s4 = inlined_call_operand.vmem [shape: f32[49,1], index: 4, kind: input, shape index: {}]   ;;  %s1420_s5 = inlined_call_operand.vmem [shape: f32[1,128], index: 5, kind: output, shape index: {}]  }
   0x1   :  { %862 = vset.pattern.permute.xlu2 %v902_v0  ;;  %861 = vset.pattern.permute.xlu1 %v902_v0  ;;  %v943_v1 = vld [vmem:[%s1415_s1 + $0x20] sm:$0xff]  ;;  %v948_v2 = vld [vmem:[%s1415_s1 + $0x10] sm:$0xff]  ;;  %v962_v4 = vld [vmem:[%s1415_s1 + $0x28] sm:$0xff]  ;;  %v906_v23 = vmov 4   ;;  %v907_v39 = vmov 5   ;;  %vm571_vm3 = vcmask 785408  }
   0x2   :  { %v953_v3 = vld [vmem:[%s1415_s1] sm:$0xff]  ;;  %860 = vset.pattern.permute.xlu0 %v902_v0  ;;  %55 = vperm.xlu2 %862, %v943_v1   ;;  %v967_v5 = vld [vmem:[%s1415_s1 + $0x18] sm:$0xff]  ;;  %v972_v6 = vld [vmem:[%s1415_s1 + $0x8] sm:$0xff] }
   0x3   :  { %45 = vperm.xlu1 %861, %v948_v2   ;;  %35 = vperm.xlu0 %860, %v953_v3   ;;  %v980_v7 = vld [vmem:[%s1415_s1 + $0x40] sm:$0xff]  ;;  %v985_v8 = vld [vmem:[%s1415_s1 + $0x38] sm:$0xff]  ;;  %v990_v9 = vld [vmem:[%s1415_s1 + $0x30] sm:$0xff] }
   0x4   :  { %v998_v10 = vld [vmem:[%s1415_s1 + $0x58] sm:$0xff]  ;;  %v1003_v11 = vld [vmem:[%s1415_s1 + $0x50] sm:$0xff]  ;;  %v1008_v12 = vld [vmem:[%s1415_s1 + $0x48] sm:$0xff] }
   0x5   :  { %v1060_v22 = vld [vmem:[%s1416_s0] sm:$0x7] }
   0x6   :  { %v1067_v24 = vperm.slane %v1060_v22, 0 }
   0xa   :  { %60 = vperm.xlu2 %862, %v962_v4  }
   0xb   :  { %50 = vperm.xlu1 %861, %v967_v5   ;;  %40 = vperm.xlu0 %860, %v972_v6  }
  0x12   :  { %75 = vperm.xlu2 %862, %v980_v7  }
  0x13   :  { %70 = vperm.xlu1 %861, %v985_v8   ;;  %65 = vperm.xlu0 %860, %v990_v9  }
  0x1a   :  { %90 = vperm.xlu2 %862, %v998_v10  }
  0x1b   :  { %85 = vperm.xlu1 %861, %v1003_v11   ;;  %80 = vperm.xlu0 %860, %v1008_v12  }
  0x22   :  { %865 = vset.pattern.permute.xlu2 %v903_v13 }
  0x23   :  { %864 = vset.pattern.permute.xlu1 %v903_v13  ;;  %863 = vset.pattern.permute.xlu0 %v903_v13 }
  0x24   :  { %115 = vperm.xlu2 %865, %v948_v2   ;;  %111 = vperm.xlu1 %864, %v972_v6  }
  0x25   :  { %107 = vperm.xlu0 %863, %v953_v3  }
  0x2c   :  { %123 = vperm.xlu2 %865, %v943_v1   ;;  %119 = vperm.xlu1 %864, %v967_v5  }
  0x2d   :  { %127 = vperm.xlu0 %863, %v962_v4  }
  0x34   :  { %135 = vperm.xlu2 %865, %v985_v8   ;;  %131 = vperm.xlu1 %864, %v990_v9  }
  0x35   :  { %139 = vperm.xlu0 %863, %v980_v7  }
  0x3c   :  { %147 = vperm.xlu2 %865, %v1003_v11   ;;  %143 = vperm.xlu1 %864, %v1008_v12  }
  0x3d   :  { %151 = vperm.xlu0 %863, %v998_v10  }
  0x44   :  { %867 = vset.pattern.permute.xlu2 %v904_v14  ;;  %866 = vset.pattern.permute.xlu1 %v904_v14 }
  0x45   :  { %868 = vset.pattern.permute.xlu0 %v904_v14  ;;  %171 = vperm.xlu2 %867, %v972_v6  }
  0x46   :  { %167 = vperm.xlu1 %866, %v953_v3   ;;  %175 = vperm.xlu0 %868, %v948_v2  }
  0x4d   :  { %183 = vperm.xlu2 %867, %v943_v1  }
  0x4e   :  { %179 = vperm.xlu1 %866, %v967_v5   ;;  %195 = vperm.xlu0 %868, %v985_v8  }
  0x55   :  { %191 = vperm.xlu2 %867, %v990_v9  }
  0x56   :  { %187 = vperm.xlu1 %866, %v962_v4   ;;  %207 = vperm.xlu0 %868, %v1003_v11  }
  0x5c   :  { %v56_v15 = vpop.permute.xlu2 %55 }
  0x5d   :  { %203 = vperm.xlu2 %867, %v1008_v12   ;;  %v98_v30 = vmul.f32 %v1067_v24, %v56_v15  ;;  %v1142_v15 = vperm.slane %v1060_v22, 1 }
  0x5e   :  { %199 = vperm.xlu1 %866, %v980_v7   ;;  %870 = vset.pattern.permute.xlu0 %v905_v16 }
  0x5f   :  { %244 = vperm.xlu0 %870, %v972_v6  }
  0x64   :  { %v1041_v17 = vpop.permute.xlu2 %60 }
  0x65   :  { %869 = vset.pattern.permute.xlu2 %v905_v16 }
  0x66   :  { %211 = vperm.xlu1 %866, %v998_v10   ;;  %240 = vperm.xlu2 %869, %v953_v3  }
  0x67   :  { %264 = vperm.xlu0 %870, %v990_v9  }
  0x6c   :  { %v1047_v18 = vpop.permute.xlu2 %75 }
  0x6e   :  { %871 = vset.pattern.permute.xlu1 %v905_v16  ;;  %252 = vperm.xlu2 %869, %v967_v5  }
  0x6f   :  { %248 = vperm.xlu1 %871, %v948_v2   ;;  %276 = vperm.xlu0 %870, %v1008_v12  }
  0x74   :  { %v1053_v19 = vpop.permute.xlu2 %90 }
  0x75   :  { %v46_v20 = vpop.permute.xlu1 %45  ;;  %v1055_v21 = vpop.permute.xlu0 %35 }
  0x76   :  { %260 = vperm.xlu2 %869, %v962_v4   ;;  %v96_v25 = vmul.f32 %v1067_v24, %v46_v20 }
  0x77   :  { %256 = vperm.xlu1 %871, %v943_v1   ;;  %872 = vset.pattern.permute.xlu0 %v906_v23 }
  0x78   :  { %442 = vperm.xlu0 %872, %v998_v10  }
  0x7d   :  { %v51_v26 = vpop.permute.xlu1 %50  ;;  %v41_v27 = vpop.permute.xlu0 %40 }
  0x7e   :  { %v116_v28 = vpop.permute.xlu2 %115  ;;  %272 = vperm.xlu2 %869, %v980_v7   ;;  %v95_v41 = vmul.f32 %v1067_v24, %v41_v27  ;;  %v97_v48 = vmul.f32 %v1067_v24, %v51_v26  ;;  %v94_v26 = vmul.f32 %v1067_v24, %v1055_v21 }
  0x7f   :  { %v1071_v29 = vadd.f32 %v116_v28, %v96_v25  ;;  %268 = vperm.xlu1 %871, %v985_v8  }
  0x80   :  { %430 = vperm.xlu0 %872, %v980_v7  }
  0x85   :  { %v71_v31 = vpop.permute.xlu1 %70  ;;  %v66_v32 = vpop.permute.xlu0 %65 }
  0x86   :  { %v124_v33 = vpop.permute.xlu2 %123  ;;  %284 = vperm.xlu2 %869, %v998_v10   ;;  %v101_v35 = vmul.f32 %v1067_v24, %v71_v31  ;;  %v100_v53 = vmul.f32 %v1067_v24, %v66_v32 }
  0x87   :  { %v1077_v34 = vadd.f32 %v124_v33, %v98_v30  ;;  %280 = vperm.xlu1 %871, %v1003_v11  }
  0x88   :  { %414 = vperm.xlu0 %872, %v943_v1  }
  0x8d   :  { %v86_v36 = vpop.permute.xlu1 %85  ;;  %v81_v37 = vpop.permute.xlu0 %80 }
  0x8e   :  { %v136_v38 = vpop.permute.xlu2 %135  ;;  %874 = vset.pattern.permute.xlu2 %v907_v39  ;;  %v104_v42 = vmul.f32 %v1067_v24, %v86_v36  ;;  %v103_v58 = vmul.f32 %v1067_v24, %v81_v37 }
  0x8f   :  { %v1082_v40 = vadd.f32 %v136_v38, %v101_v35  ;;  %873 = vset.pattern.permute.xlu1 %v906_v23  ;;  %502 = vperm.xlu2 %874, %v998_v10  }
  0x90   :  { %438 = vperm.xlu1 %873, %v1003_v11   ;;  %879 = vset.pattern.permute.xlu0 %v907_v39 }
  0x91   :  { %490 = vperm.xlu0 %879, %v980_v7  }
  0x96   :  { %v148_v43 = vpop.permute.xlu2 %147  ;;  %v112_v44 = vpop.permute.xlu1 %111 }
  0x97   :  { %v1090_v45 = vadd.f32 %v148_v43, %v104_v42  ;;  %v1092_v46 = vadd.f32 %v112_v44, %v95_v41  ;;  %v1094_v47 = vpop.permute.xlu0 %107  ;;  %498 = vperm.xlu2 %874, %v1003_v11  }
  0x98   :  { %434 = vperm.xlu1 %873, %v1008_v12  }
  0x99   :  { %470 = vperm.xlu0 %879, %v967_v5  }
  0x9e   :  { %v120_v49 = vpop.permute.xlu1 %119 }
  0x9f   :  { %v1100_v50 = vadd.f32 %v120_v49, %v97_v48  ;;  %v1102_v51 = vpop.permute.xlu0 %127  ;;  %v172_v52 = vpop.permute.xlu2 %171  ;;  %876 = vset.pattern.permute.xlu2 %v906_v23 }
  0xa0   :  { %875 = vset.pattern.permute.xlu1 %v907_v39  ;;  %426 = vperm.xlu2 %876, %v985_v8   ;;  %v216_v25 = vmul.f32 %v1142_v15, %v172_v52 }
  0xa1   :  { %494 = vperm.xlu1 %875, %v1008_v12   ;;  %458 = vperm.xlu0 %879, %v953_v3  }
  0xa2   :  { %v228_v28 = vadd.f32 %v216_v25, %v1092_v46  ;;  %v99_v46 = vmul.f32 %v1067_v24, %v1041_v17 }
  0xa6   :  { %v132_v54 = vpop.permute.xlu1 %131 }
  0xa7   :  { %v1109_v55 = vadd.f32 %v132_v54, %v100_v53  ;;  %v1111_v56 = vpop.permute.xlu0 %139  ;;  %v1113_v57 = vpop.permute.xlu2 %183 }
  0xa8   :  { %878 = vset.pattern.permute.xlu2 %v907_v39 }
  0xa9   :  { %877 = vset.pattern.permute.xlu1 %v906_v23  ;;  %486 = vperm.xlu2 %878, %v985_v8  }
  0xaa   :  { %422 = vperm.xlu1 %877, %v990_v9   ;;  %886 = vset.pattern.permute.xlu0 %v902_v0 }
  0xae   :  { %v144_v59 = vpop.permute.xlu1 %143 }
  0xaf   :  { %v1120_v60 = vadd.f32 %v144_v59, %v103_v58  ;;  %v1122_v61 = vpop.permute.xlu0 %151  ;;  %v192_v62 = vpop.permute.xlu2 %191  ;;  %v159_v59 = vadd.f32 %v1102_v51, %v99_v46 }
  0xb0   :  { %v221_v58 = vmul.f32 %v1142_v15, %v192_v62 }
  0xb1   :  { %482 = vperm.xlu2 %878, %v990_v9  }
  0xb2   :  { %418 = vperm.xlu1 %877, %v962_v4  }
  0xb7   :  { %v1126_v63 = vpop.permute.xlu2 %203 }
  0xb8   :  { %v168_v7 = vpop.permute.xlu1 %167  ;;  %v176_v8 = vpop.permute.xlu0 %175 }
  0xb9   :  { %881 = vset.pattern.permute.xlu2 %v906_v23  ;;  %v215_v27 = vmul.f32 %v1142_v15, %v168_v7  ;;  %v217_v31 = vmul.f32 %v1142_v15, %v176_v8 }
  0xba   :  { %880 = vset.pattern.permute.xlu1 %v907_v39  ;;  %410 = vperm.xlu2 %881, %v967_v5  }
  0xbb   :  { %478 = vperm.xlu1 %880, %v962_v4   ;;  %v229_v37 = vadd.f32 %v217_v31, %v1071_v29  ;;  %v219_v29 = vmul.f32 %v1142_v15, %v1113_v57 }
  0xc0   :  { %v180_v10 = vpop.permute.xlu1 %179  ;;  %v241_v11 = vpop.permute.xlu2 %240 }
  0xc1   :  { %v1132_v12 = vpop.permute.xlu0 %195  ;;  %v218_v35 = vmul.f32 %v1142_v15, %v180_v10  ;;  %v231_v10 = vadd.f32 %v219_v29, %v1077_v34 }
  0xc2   :  { %406 = vperm.xlu2 %881, %v948_v2   ;;  %v222_v34 = vmul.f32 %v1142_v15, %v1132_v12 }
  0xc3   :  { %474 = vperm.xlu1 %880, %v943_v1  }
  0xc8   :  { %v188_v9 = vpop.permute.xlu1 %187  ;;  %v253_v13 = vpop.permute.xlu2 %252 }
  0xc9   :  { %v1138_v5 = vpop.permute.xlu0 %207  ;;  %v220_v49 = vmul.f32 %v1142_v15, %v188_v9 }
  0xca   :  { %883 = vset.pattern.permute.xlu2 %v907_v39 }
  0xcb   :  { %882 = vset.pattern.permute.xlu1 %v906_v23  ;;  %466 = vperm.xlu2 %883, %v948_v2   ;;  %v1147_v23 = vperm.slane %v1060_v22, 2 }
  0xcc   :  { %402 = vperm.xlu1 %882, %v972_v6  }
  0xcd   :  { %v288_v30 = vmul.f32 %v1147_v23, %v241_v11  ;;  %v291_v42 = vmul.f32 %v1147_v23, %v253_v13  ;;  %v232_v11 = vadd.f32 %v220_v49, %v159_v59 }
  0xd0   :  { %v200_v4 = vpop.permute.xlu1 %199  ;;  %v261_v1 = vpop.permute.xlu2 %260 }
  0xd1   :  { %v245_v20 = vpop.permute.xlu0 %244  ;;  %v293_v17 = vmul.f32 %v1147_v23, %v261_v1 }
  0xd3   :  { %462 = vperm.xlu2 %883, %v972_v6   ;;  %v289_v6 = vmul.f32 %v1147_v23, %v245_v20  ;;  %v233_v20 = vadd.f32 %v221_v58, %v1109_v55  ;;  %v1197_v51 = vadd.f32 %v293_v17, %v232_v11 }
  0xd4   :  { %398 = vperm.xlu1 %882, %v953_v3   ;;  %v154_v3 = vadd.f32 %v1094_v47, %v94_v26  ;;  %v230_v47 = vadd.f32 %v218_v35, %v1100_v50  ;;  %v102_v26 = vmul.f32 %v1067_v24, %v1047_v18 }
  0xd5   :  { %v1161_v32 = vadd.f32 %v289_v6, %v228_v28  ;;  %v335_v18 = vmul.f32 %v1197_v51, %v1197_v51 }
  0xd6   :  { %v227_v22 = vadd.f32 %v215_v27, %v154_v3  ;;  %v1188_v7 = vadd.f32 %v291_v42, %v230_v47  ;;  %v223_v27 = vmul.f32 %v1142_v15, %v200_v4  ;;  %v105_v47 = vmul.f32 %v1067_v24, %v1053_v19 }
  0xd7   :  { %v331_v38 = vmul.f32 %v1161_v32, %v1161_v32 }
  0xd8   :  { %v1149_v2 = vpop.permute.xlu1 %211  ;;  %v1163_v21 = vadd.f32 %v288_v30, %v227_v22  ;;  %v273_v33 = vpop.permute.xlu2 %272  ;;  %v333_v62 = vmul.f32 %v1188_v7, %v1188_v7  ;;  %v162_v30 = vadd.f32 %v1111_v56, %v102_v26  ;;  %v224_v22 = vmul.f32 %v1142_v15, %v1126_v63 }
  0xd9   :  { %v265_v48 = vpop.permute.xlu0 %264  ;;  %v296_v12 = vmul.f32 %v1147_v23, %v273_v33  ;;  %v226_v49 = vmul.f32 %v1142_v15, %v1149_v2 }
  0xda   :  { %v330_v41 = vmul.f32 %v1163_v21, %v1163_v21  ;;  %v312_v43 = vadd.f32 %v1161_v32, %v1163_v21  ;;  %v294_v50 = vmul.f32 %v1147_v23, %v265_v48  ;;  %v236_v33 = vadd.f32 %v224_v22, %v1120_v60 }
  0xdb   :  { %885 = vset.pattern.permute.xlu2 %v902_v0  ;;  %v225_v48 = vmul.f32 %v1142_v15, %v1138_v5 }
  0xdc   :  { %884 = vset.pattern.permute.xlu1 %v902_v0  ;;  %v342_v52 = vadd.f32 %v331_v38, %v330_v41  ;;  %v1207_v6 = vadd.f32 %v294_v50, %v233_v20 }
  0xdd   :  { %v237_v59 = vadd.f32 %v225_v48, %v1090_v45 }
  0xde   :  { %v336_v38 = vmul.f32 %v1207_v6, %v1207_v6 }
  0xe0   :  { %v285_v9 = vpop.permute.xlu2 %284 }
  0xe1   :  { %v249_v36 = vpop.permute.xlu1 %248  ;;  %v277_v31 = vpop.permute.xlu0 %276  ;;  %v299_v19 = vmul.f32 %v1147_v23, %v285_v9 }
  0xe2   :  { %v290_v39 = vmul.f32 %v1147_v23, %v249_v36  ;;  %v234_v36 = vadd.f32 %v222_v34, %v1082_v40  ;;  %v297_v56 = vmul.f32 %v1147_v23, %v277_v31 }
  0xe4   :  { %v1175_v44 = vadd.f32 %v290_v39, %v229_v37  ;;  %v235_v37 = vadd.f32 %v223_v27, %v162_v30 }
  0xe6   :  { %v313_v53 = vadd.f32 %v312_v43, %v1175_v44  ;;  %v332_v54 = vmul.f32 %v1175_v44, %v1175_v44  ;;  %v1228_v46 = vadd.f32 %v296_v12, %v235_v37 }
  0xe8   :  { %v343_v57 = vadd.f32 %v342_v52, %v332_v54  ;;  %v314_v1 = vadd.f32 %v313_v53, %v1188_v7  ;;  %v1238_v52 = vadd.f32 %v297_v56, %v236_v33  ;;  %v165_v54 = vadd.f32 %v1122_v61, %v105_v47 }
  0xe9   :  { %v257_v8 = vpop.permute.xlu1 %256  ;;  %v1225_v43 = vpop.permute.xlu2 %502  ;;  %v338_v58 = vmul.f32 %v1228_v46, %v1228_v46 }
  0xea   :  { %v292_v13 = vmul.f32 %v1147_v23, %v257_v8  ;;  %v344_v28 = vadd.f32 %v343_v57, %v333_v62  ;;  %v238_v15 = vadd.f32 %v226_v49, %v165_v54  ;;  %v339_v17 = vmul.f32 %v1238_v52, %v1238_v52 }
  0xec   :  { %v1199_v25 = vadd.f32 %v292_v13, %v231_v10  ;;  %v1253_v8 = vadd.f32 %v299_v19, %v238_v15 }
  0xee   :  { %v315_v55 = vadd.f32 %v314_v1, %v1199_v25  ;;  %v334_v3 = vmul.f32 %v1199_v25, %v1199_v25  ;;  %v341_v20 = vmul.f32 %v1253_v8, %v1253_v8 }
  0xf0   :  { %v316_v4 = vadd.f32 %v315_v55, %v1197_v51  ;;  %v345_v35 = vadd.f32 %v344_v28, %v334_v3 }
  0xf1   :  { %v269_v39 = vpop.permute.xlu1 %268  ;;  %v1257_v9 = vpop.permute.xlu2 %498 }
  0xf2   :  { %v346_v41 = vadd.f32 %v345_v35, %v335_v18  ;;  %v295_v63 = vmul.f32 %v1147_v23, %v269_v39  ;;  %v317_v42 = vadd.f32 %v316_v4, %v1207_v6  ;;  %v443_v39 = vpop.permute.xlu0 %442 }
  0xf4   :  { %v1230_v29 = vadd.f32 %v295_v63, %v234_v36  ;;  %v347_v40 = vadd.f32 %v346_v41, %v336_v38 }
  0xf6   :  { %v318_v53 = vadd.f32 %v317_v42, %v1230_v29  ;;  %v337_v60 = vmul.f32 %v1230_v29, %v1230_v29 }
  0xf8   :  { %v319_v24 = vadd.f32 %v318_v53, %v1228_v46  ;;  %v348_v5 = vadd.f32 %v347_v40, %v337_v60 }
  0xf9   :  { %v281_v2 = vpop.permute.xlu1 %280 }
  0xfa   :  { %v349_v57 = vadd.f32 %v348_v5, %v338_v58  ;;  %v298_v50 = vmul.f32 %v1147_v23, %v281_v2  ;;  %v320_v61 = vadd.f32 %v319_v24, %v1238_v52  ;;  %v1265_v30 = vpop.permute.xlu2 %426 }
  0xfc   :  { %v1255_v10 = vadd.f32 %v298_v50, %v237_v59  ;;  %v350_v11 = vadd.f32 %v349_v57, %v339_v17 }
  0xfe   :  { %v321_v13 = vadd.f32 %v320_v61, %v1255_v10  ;;  %v340_v45 = vmul.f32 %v1255_v10, %v1255_v10 }
 0x100   :  { %v322_v62 = vadd.f32 %v321_v13, %v1253_v8  ;;  %v351_v23 = vadd.f32 %v350_v11, %v340_v45 }
 0x102   :  { %v323_v1 = vrot.slane %v322_v62, 4  ;;  %v352_v26 = vadd.f32 %v351_v23, %v341_v20  ;;  %v439_v34 = vpop.permute.xlu1 %438 }
 0x103   :  { %v1275_v33 = vpop.permute.xlu2 %486 }
 0x104   :  { %v324_v27 = vadd.f32 %v323_v1, %v322_v62  ;;  %v353_v55 = vrot.slane %v352_v26, 4 }
 0x106   :  { %v325_v3 = vrot.slane %v324_v27, 2  ;;  %v354_v28 = vadd.f32 %v353_v55, %v352_v26  ;;  %v1304_v55 = vld [vmem:[%s1417_s3 + $0x18] sm:$0xff] }
 0x108   :  { %v326_v22 = vadd.f32 %v325_v3, %v324_v27  ;;  %v355_v31 = vrot.slane %v354_v28, 2 }
 0x10a   :  { %v327_v18 = vrot.slane %v326_v22, 1  ;;  %v356_v12 = vadd.f32 %v355_v31, %v354_v28  ;;  %v435_v4 = vpop.permute.xlu1 %434 }
 0x10b   :  { %v483_v24 = vpop.permute.xlu2 %482 }
 0x10c   :  { %v328_v35 = vadd.f32 %v327_v18, %v326_v22  ;;  %v357_v36 = vrot.slane %v356_v12, 1 }
 0x10e   :  { %v1267_v37 = vmul.f32 0.010416667, %v328_v35  ;;  %v358_v38 = vadd.f32 %v357_v36, %v356_v12 }
 0x110   :  { %v359_v56 = vmul.f32 0.010416667, %v358_v38  ;;  %v360_v41 = vmul.f32 %v1267_v37, %v1267_v37  ;;  %v372_v63 = vsub.f32 %v1255_v10, %v1267_v37  ;;  %v369_v42 = vsub.f32 %v1230_v29, %v1267_v37 }
 0x111   :  { %v371_v40 = vsub.f32 %v1238_v52, %v1267_v37  ;;  %v373_v47 = vsub.f32 %v1253_v8, %v1267_v37  ;;  %v370_v48 = vsub.f32 %v1228_v46, %v1267_v37  ;;  %v366_v53 = vsub.f32 %v1199_v25, %v1267_v37  ;;  %v431_v46 = vpop.permute.xlu0 %430 }
 0x112   :  { %v361_v49 = vsub.f32 %v359_v56, %v360_v41  ;;  %v368_v60 = vsub.f32 %v1207_v6, %v1267_v37  ;;  %v364_v29 = vsub.f32 %v1175_v44, %v1267_v37  ;;  %v367_v52 = vsub.f32 %v1197_v51, %v1267_v37  ;;  %v1296_v44 = vld [vmem:[%s1417_s3] sm:$0xff] }
 0x113   :  { %v495_v54 = vpop.permute.xlu1 %494  ;;  %v363_v58 = vsub.f32 %v1161_v32, %v1267_v37  ;;  %543 = vperm.xlu1 %884, %v1296_v44   ;;  %v365_v61 = vsub.f32 %v1188_v7, %v1267_v37  ;;  %v362_v38 = vsub.f32 %v1163_v21, %v1267_v37 }
 0x114   :  { %v374_v19 = vadd.f32 1e-05, %v361_v49  ;;  %v411_v51 = vpop.permute.xlu2 %410 }
 0x116   :  { %896 = vrsqrt.f32 %v374_v19  ;;  %vm381_vm1 = vweird.f32 %v374_v19 }
 0x119   :  { %v415_v17 = vpop.permute.xlu0 %414 }
 0x11b   :  { %558 = vperm.xlu1 %884, %v1304_v55  }
 0x11c   :  { %v897_v5 = vpop.eup %896  ;;  %v423_v59 = vpop.permute.xlu1 %422 }
 0x11d   :  { %v376_v25 = vmul.f32 %v897_v5, %v374_v19  ;;  %vm382_vm0 = vweird.f32 %v897_v5  ;;  %v407_v36 = vpop.permute.xlu2 %406 }
 0x11e   :  { %vm383_vm2 = vmor %vm381_vm1, %vm382_vm0 }
 0x11f   :  { %v377_v15 = vmul.f32 %v897_v5, %v376_v25 }
 0x121   :  { %v378_v2 = vmul.f32 0.5, %v377_v15  ;;  %v491_v31 = vpop.permute.xlu0 %490 }
 0x123   :  { %v379_v6 = vsub.f32 1.5, %v378_v2 }
 0x124   :  { %v419_v57 = vpop.permute.xlu1 %418 }
 0x125   :  { %v380_v32 = vmul.f32 %v897_v5, %v379_v6 }
 0x127   :  { %v384_v50 = vsel %vm383_vm2, %v897_v5, %v380_v32 }
 0x128   :  { %v395_v8 = vmul.f32 %v384_v50, %v372_v63  ;;  %v392_v10 = vmul.f32 %v384_v50, %v369_v42  ;;  %v394_v11 = vmul.f32 %v384_v50, %v371_v40  ;;  %v396_v13 = vmul.f32 %v384_v50, %v373_v47 }
 0x129   :  { %v393_v45 = vmul.f32 %v384_v50, %v370_v48  ;;  %v388_v20 = vmul.f32 %v384_v50, %v365_v61  ;;  %v389_v62 = vmul.f32 %v384_v50, %v366_v53  ;;  %v391_v23 = vmul.f32 %v384_v50, %v368_v60 }
 0x12a   :  { %v455_v1 = vmul.f32 %v439_v34, %v395_v8  ;;  %v454_v26 = vmul.f32 %v435_v4, %v394_v11  ;;  %v456_v27 = vmul.f32 %v443_v39, %v396_v13  ;;  %v387_v22 = vmul.f32 %v384_v50, %v364_v29  ;;  %v533_v13 = vld [vmem:[%s1417_s3 + $0x20] sm:$0xff] }
 0x12b   :  { %v453_v28 = vmul.f32 %v431_v46, %v393_v45  ;;  %v390_v18 = vmul.f32 %v384_v50, %v367_v52  ;;  %v452_v34 = vmul.f32 %v1265_v30, %v392_v10  ;;  %v451_v39 = vmul.f32 %v423_v59, %v391_v23  ;;  %v537_v45 = vld [vmem:[%s1418_s2 + $0x10] sm:$0xff]  ;;  %v536_v23 = vld [vmem:[%s1418_s2 + $0x8] sm:$0xff] }
 0x12c   :  { %v515_v3 = vadd.f32 %v1257_v9, %v455_v1  ;;  %v516_v7 = vadd.f32 %v1225_v43, %v456_v27  ;;  %v514_v35 = vadd.f32 %v495_v54, %v454_v26  ;;  %v386_v43 = vmul.f32 %v384_v50, %v363_v58  ;;  %v467_v54 = vpop.permute.xlu2 %466  ;;  %v538_v1 = vld [vmem:[%s1418_s2 + $0x18] sm:$0xff]  ;;  %v540_v26 = vld [vmem:[%s1418_s2 + $0x28] sm:$0xff] }
 0x12d   :  { %v479_v12 = vpop.permute.xlu1 %478  ;;  %v513_v9 = vadd.f32 %v491_v31, %v453_v28  ;;  %v1312_v41 = vmul.f32 %v384_v50, %v362_v38  ;;  %v512_v63 = vadd.f32 %v1275_v33, %v452_v34  ;;  %v511_v30 = vadd.f32 %v483_v24, %v451_v39  ;;  %v471_v33 = vpop.permute.xlu0 %470  ;;  %v531_v50 = vld [vmem:[%s1417_s3 + $0x10] sm:$0xff]  ;;  %v747_v27 = vld [vmem:[%s1419_s4 + $0x8] sm:$0xff] }
 0x12e   :  { %v528_v4 = vmax.f32 %v516_v7, 0.0  ;;  %v527_v56 = vmax.f32 %v515_v3, 0.0  ;;  %v526_v42 = vmax.f32 %v514_v35, 0.0  ;;  %v450_v21 = vmul.f32 %v419_v57, %v390_v18  ;;  %553 = vperm.xlu0 %886, %v531_v50   ;;  %v748_v3 = vld [vmem:[%s1419_s4 + $0x10] sm:$0xff] }
 0x12f   :  { %v525_v40 = vmax.f32 %v513_v9, 0.0  ;;  %v524_v47 = vmax.f32 %v512_v63, 0.0  ;;  %v448_v48 = vmul.f32 %v411_v51, %v388_v20  ;;  %v449_v49 = vmul.f32 %v415_v17, %v389_v62  ;;  %v1318_v17 = vld [vmem:[%s1417_s3 + $0x28] sm:$0xff]  ;;  %v539_v20 = vld [vmem:[%s1418_s2 + $0x20] sm:$0xff]  ;;  %v752_v7 = vld [vmem:[%s1419_s4 + $0x30] sm:$0x1] }
 0x130   :  { %594 = vmatpush.msra.mxu0 %v528_v4  ;;  %818 = vmatpush.msra.mxu1 %v528_v4  ;;  %v510_v53 = vadd.f32 %v479_v12, %v450_v21  ;;  %v523_v60 = vmax.f32 %v511_v30, 0.0  ;;  %v447_v29 = vmul.f32 %v407_v36, %v387_v22  ;;  %v530_v51 = vld [vmem:[%s1417_s3 + $0x8] sm:$0xff]  ;;  %v535_v62 = vld [vmem:[%s1418_s2] sm:$0xff] }
 0x131   :  { %819 = vmatpush.msra.mxu2 %v528_v4  ;;  %820 = vmatpush.msra.mxu3 %v528_v4  ;;  %v508_v58 = vadd.f32 %v471_v33, %v448_v48 }
 0x132   :  { %595 = vmatpush.msra.mxu0 %v527_v56  ;;  %821 = vmatpush.msra.mxu1 %v527_v56  ;;  %v522_v19 = vmax.f32 %v510_v53, 0.0  ;;  %v507_v46 = vadd.f32 %v467_v54, %v447_v29 }
 0x133   :  { %822 = vmatpush.msra.mxu2 %v527_v56  ;;  %823 = vmatpush.msra.mxu3 %v527_v56  ;;  %v520_v5 = vmax.f32 %v508_v58, 0.0 }
 0x134   :  { %596 = vmatpush.msra.mxu0 %v526_v42  ;;  %824 = vmatpush.msra.mxu1 %v526_v42  ;;  %v519_v15 = vmax.f32 %v507_v46, 0.0  ;;  %v463_v2 = vpop.permute.xlu2 %462 }
 0x135   :  { %825 = vmatpush.msra.mxu2 %v526_v42  ;;  %826 = vmatpush.msra.mxu3 %v526_v42  ;;  %v475_v37 = vpop.permute.xlu1 %474  ;;  %v459_v8 = vpop.permute.xlu0 %458 }
 0x136   :  { %597 = vmatpush.msra.mxu0 %v525_v40  ;;  %827 = vmatpush.msra.mxu1 %v525_v40  ;;  %v509_v52 = vadd.f32 %v475_v37, %v449_v49 }
 0x137   :  { %828 = vmatpush.msra.mxu2 %v525_v40  ;;  %829 = vmatpush.msra.mxu3 %v525_v40 }
 0x138   :  { %598 = vmatpush.msra.mxu0 %v524_v47  ;;  %830 = vmatpush.msra.mxu1 %v524_v47  ;;  %v521_v24 = vmax.f32 %v509_v52, 0.0 }
 0x139   :  { %831 = vmatpush.msra.mxu2 %v524_v47  ;;  %832 = vmatpush.msra.mxu3 %v524_v47 }
 0x13a   :  { %599 = vmatpush.msra.mxu0 %v523_v60  ;;  %833 = vmatpush.msra.mxu1 %v523_v60 }
 0x13b   :  { %834 = vmatpush.msra.mxu2 %v523_v60  ;;  %835 = vmatpush.msra.mxu3 %v523_v60 }
 0x13c   :  { %600 = vmatpush.msra.mxu0 %v522_v19  ;;  %836 = vmatpush.msra.mxu1 %v522_v19 }
 0x13d   :  { %837 = vmatpush.msra.mxu2 %v522_v19  ;;  %838 = vmatpush.msra.mxu3 %v522_v19 }
 0x13e   :  { %v403_v59 = vpop.permute.xlu1 %402  ;;  %601 = vmatpush.msra.mxu0 %v521_v24  ;;  %839 = vmatpush.msra.mxu1 %v521_v24 }
 0x13f   :  { %v446_v25 = vmul.f32 %v403_v59, %v386_v43  ;;  %840 = vmatpush.msra.mxu2 %v521_v24  ;;  %841 = vmatpush.msra.mxu3 %v521_v24 }
 0x140   :  { %602 = vmatpush.msra.mxu0 %v520_v5  ;;  %842 = vmatpush.msra.mxu1 %v520_v5 }
 0x141   :  { %v506_v6 = vadd.f32 %v463_v2, %v446_v25  ;;  %843 = vmatpush.msra.mxu2 %v520_v5  ;;  %844 = vmatpush.msra.mxu3 %v520_v5 }
 0x142   :  { %603 = vmatpush.msra.mxu0 %v519_v15  ;;  %845 = vmatpush.msra.mxu1 %v519_v15 }
 0x143   :  { %v518_v57 = vmax.f32 %v506_v6, 0.0  ;;  %846 = vmatpush.msra.mxu2 %v519_v15  ;;  %847 = vmatpush.msra.mxu3 %v519_v15 }
 0x144   :  { %568 = vperm.xlu1 %884, %v1318_v17   ;;  %548 = vperm.xlu2 %885, %v530_v51  }
 0x145   :  { %604 = vmatpush.msra.mxu0 %v518_v57  ;;  %848 = vmatpush.msra.mxu1 %v518_v57 }
 0x146   :  { %849 = vmatpush.msra.mxu2 %v518_v57  ;;  %850 = vmatpush.msra.mxu3 %v518_v57  ;;  %v399_v32 = vpop.permute.xlu1 %398 }
 0x147   :  { %v445_v61 = vmul.f32 %v399_v32, %v1312_v41  ;;  %888 = vset.pattern.permute.xlu0 %v904_v14 }
 0x148   :  { %685 = vperm.xlu0 %888, %v530_v51  }
 0x149   :  { %v505_v10 = vadd.f32 %v459_v8, %v445_v61 }
 0x14b   :  { %v517_v11 = vmax.f32 %v505_v10, 0.0 }
 0x14c   :  { %889 = vset.pattern.permute.xlu1 %v904_v14  ;;  %563 = vperm.xlu2 %885, %v533_v13  }
 0x14d   :  { %605 = vmatpush.msra.mxu0 %v517_v11  ;;  %851 = vmatpush.msra.mxu1 %v517_v11 }
 0x14e   :  { %852 = vmatpush.msra.mxu2 %v517_v11  ;;  %853 = vmatpush.msra.mxu3 %v517_v11 }
 0x14f   :  { %814 = vmatmul.msk.f32.vlgmr.msra.gmra.mxu2 %vm571_vm3, %v537_v45  ;;  %816 = vmatmul.msk.f32.vlgmr.msra.gmra.mxu3 %vm571_vm3, %v539_v20 }
 0x150   :  { %812 = vmatmul.msk.f32.vlgmr.msra.gmra.mxu0 %vm571_vm3, %v535_v62  ;;  %813 = vmatmul.msk.f32.vlgmr.msra.gmra.mxu1 %vm571_vm3, %v536_v23 }
 0x151   :  { %689 = vperm.xlu1 %889, %v531_v50   ;;  %890 = vset.pattern.permute.xlu0 %v905_v16 }
 0x152   :  { %711 = vperm.xlu0 %890, %v1296_v44  }
 0x154   :  { %887 = vset.pattern.permute.xlu2 %v904_v14  ;;  %v750_v14 = vld [vmem:[%s1419_s4 + $0x20] sm:$0xff] }
 0x155   :  { %681 = vperm.xlu2 %887, %v1296_v44   ;;  %v746_v44 = vld [vmem:[%s1419_s4] sm:$0xff] }
 0x157   :  { %815 = vmatmul.msk.f32.gmra.mxu2 %vm571_vm3, %v538_v1  ;;  %817 = vmatmul.msk.f32.gmra.mxu3 %vm571_vm3, %v540_v26 }
 0x159   :  { %697 = vperm.xlu1 %889, %v533_v13  }
 0x15a   :  { %894 = vset.pattern.permute.xlu0 %v902_v0 }
 0x15b   :  { %760 = vperm.xlu0 %894, %v747_v27  }
 0x15d   :  { %693 = vperm.xlu2 %887, %v1304_v55  }
 0x161   :  { %891 = vset.pattern.permute.xlu1 %v905_v16 }
 0x162   :  { %715 = vperm.xlu1 %891, %v530_v51  }
 0x163   :  { %775 = vperm.xlu0 %894, %v750_v14  }
 0x165   :  { %701 = vperm.xlu2 %887, %v1318_v17  }
 0x16a   :  { %723 = vperm.xlu1 %891, %v1304_v55   ;;  %v749_v55 = vld [vmem:[%s1419_s4 + $0x18] sm:$0xff] }
 0x16d   :  { %892 = vset.pattern.permute.xlu2 %v905_v16  ;;  %v751_v16 = vld [vmem:[%s1419_s4 + $0x28] sm:$0xff] }
 0x16e   :  { %719 = vperm.xlu2 %892, %v531_v50  }
 0x172   :  { %727 = vperm.xlu1 %891, %v533_v13  }
 0x176   :  { %893 = vset.pattern.permute.xlu2 %v902_v0 }
 0x177   :  { %755 = vperm.xlu2 %893, %v746_v44  }
 0x17a   :  { %731 = vperm.xlu1 %891, %v1318_v17  }
 0x17f   :  { %765 = vperm.xlu2 %893, %v748_v3  }
 0x182   :  { %895 = vset.pattern.permute.xlu1 %v902_v0 }
 0x183   :  { %780 = vperm.xlu1 %895, %v751_v16  }
 0x185   :  { %v544_v28 = vpop.permute.xlu1 %543 }
 0x187   :  { %770 = vperm.xlu2 %893, %v749_v55  }
 0x18d   :  { %v559_v31 = vpop.permute.xlu1 %558 }
 0x18f   :  { %802 = vperm.xlu2 %893, %v752_v7  }
 0x19e   :  { %v549_v22 = vpop.permute.xlu2 %548 }
 0x1a0   :  { %v554_v4 = vpop.permute.xlu0 %553 }
 0x1a6   :  { %v564_v18 = vpop.permute.xlu2 %563 }
 0x1af   :  { %v1401_v41 = vpop.permute.xlu2 %681 }
 0x1b6   :  { %v569_v36 = vpop.permute.xlu1 %568 }
 0x1b7   :  { %v694_v5 = vpop.permute.xlu2 %693 }
 0x1ba   :  { %v686_v14 = vpop.permute.xlu0 %685 }
 0x1bf   :  { %v702_v11 = vpop.permute.xlu2 %701 }
 0x1c3   :  { %v690_v49 = vpop.permute.xlu1 %689 }
 0x1c8   :  { %v720_v27 = vpop.permute.xlu2 %719 }
 0x1cb   :  { %v698_v6 = vpop.permute.xlu1 %697 }
 0x1cd   :  { %v607_v12 = vpop.f32.mrf.mxu0  ;;  %v610_v34 = vpop.f32.mrf.mxu1 }
 0x1ce   :  { %v1391_v38 = vadd.f32 %v607_v12, %v544_v28  ;;  %v1393_v39 = vadd.f32 %v610_v34, %v549_v22  ;;  %v712_v22 = vpop.permute.xlu0 %711 }
 0x1d0   :  { %v637_v9 = vmul.f32 %v1391_v38, %v1391_v38  ;;  %v638_v43 = vmul.f32 %v1393_v39, %v1393_v39  ;;  %v625_v63 = vadd.f32 %v1393_v39, %v1391_v38 }
 0x1d1   :  { %v756_v7 = vpop.permute.xlu2 %755 }
 0x1d2   :  { %v613_v35 = vpop.f32.mrf.mxu2  ;;  %v619_v0 = vpop.f32.mrf.mxu3  ;;  %v643_v21 = vadd.f32 %v638_v43, %v637_v9 }
 0x1d3   :  { %v1395_v56 = vadd.f32 %v613_v35, %v554_v4  ;;  %v620_v47 = vadd.f32 %v619_v0, %v564_v18 }
 0x1d4   :  { %v716_v23 = vpop.permute.xlu1 %715 }
 0x1d5   :  { %v639_v42 = vmul.f32 %v1395_v56, %v1395_v56  ;;  %v626_v37 = vadd.f32 %v625_v63, %v1395_v56  ;;  %v641_v54 = vmul.f32 %v620_v47, %v620_v47 }
 0x1d7   :  { %v644_v53 = vadd.f32 %v643_v21, %v639_v42 }
 0x1da   :  { %v616_v30 = vpop.f32.mrf.mxu2  ;;  %v622_v40 = vpop.f32.mrf.mxu3 }
 0x1db   :  { %v617_v48 = vadd.f32 %v616_v30, %v559_v31  ;;  %v623_v29 = vadd.f32 %v622_v40, %v569_v36 }
 0x1dc   :  { %v724_v44 = vpop.permute.xlu1 %723 }
 0x1dd   :  { %v627_v33 = vadd.f32 %v626_v37, %v617_v48  ;;  %v640_v60 = vmul.f32 %v617_v48, %v617_v48  ;;  %v642_v46 = vmul.f32 %v623_v29, %v623_v29 }
 0x1df   :  { %v645_v52 = vadd.f32 %v644_v53, %v640_v60  ;;  %v628_v58 = vadd.f32 %v627_v33, %v620_v47  ;;  %v766_v60 = vpop.permute.xlu2 %765 }
 0x1e1   :  { %v629_v19 = vadd.f32 %v628_v58, %v623_v29  ;;  %v646_v24 = vadd.f32 %v645_v52, %v641_v54 }
 0x1e3   :  { %v630_v59 = vrot.slane %v629_v19, 4  ;;  %v647_v25 = vadd.f32 %v646_v24, %v642_v46 }
 0x1e4   :  { %v728_v18 = vpop.permute.xlu1 %727 }
 0x1e5   :  { %v631_v15 = vadd.f32 %v630_v59, %v629_v19  ;;  %v648_v2 = vrot.slane %v647_v25, 4 }
 0x1e7   :  { %v632_v17 = vrot.slane %v631_v15, 2  ;;  %v649_v51 = vadd.f32 %v648_v2, %v647_v25 }
 0x1e9   :  { %v633_v57 = vadd.f32 %v632_v17, %v631_v15  ;;  %v650_v32 = vrot.slane %v649_v51, 2 }
 0x1eb   :  { %v634_v50 = vrot.slane %v633_v57, 1  ;;  %v651_v61 = vadd.f32 %v650_v32, %v649_v51 }
 0x1ed   :  { %v635_v8 = vadd.f32 %v634_v50, %v633_v57  ;;  %v652_v10 = vrot.slane %v651_v61, 1  ;;  %v771_v57 = vpop.permute.xlu2 %770 }
 0x1ef   :  { %v636_v13 = vmul.f32 0.020833334, %v635_v8  ;;  %v653_v45 = vadd.f32 %v652_v10, %v651_v61 }
 0x1f1   :  { %v654_v20 = vmul.f32 0.020833334, %v653_v45  ;;  %v655_v62 = vmul.f32 %v636_v13, %v636_v13  ;;  %v659_v34 = vsub.f32 %v1395_v56, %v636_v13  ;;  %v660_v4 = vsub.f32 %v617_v48, %v636_v13  ;;  %v761_v48 = vpop.permute.xlu0 %760 }
 0x1f2   :  { %v661_v35 = vsub.f32 %v620_v47, %v636_v13  ;;  %v662_v0 = vsub.f32 %v623_v29, %v636_v13  ;;  %v658_v9 = vsub.f32 %v1393_v39, %v636_v13  ;;  %v657_v43 = vsub.f32 %v1391_v38, %v636_v13  ;;  %v732_v38 = vpop.permute.xlu1 %731 }
 0x1f3   :  { %v656_v1 = vsub.f32 %v654_v20, %v655_v62 }
 0x1f5   :  { %v663_v26 = vadd.f32 1e-05, %v656_v1 }
 0x1f7   :  { %898 = vrsqrt.f32 %v663_v26  ;;  %vm670_vm5 = vweird.f32 %v663_v26 }
 0x1f9   :  { %v776_v61 = vpop.permute.xlu0 %775 }
 0x1fa   :  { %v781_v8 = vpop.permute.xlu1 %780 }
 0x1fd   :  { %v899_v3 = vpop.eup %898 }
 0x1fe   :  { %v665_v16 = vmul.f32 %v899_v3, %v663_v26  ;;  %vm671_vm4 = vweird.f32 %v899_v3 }
 0x1ff   :  { %vm672_vm6 = vmor %vm670_vm5, %vm671_vm4 }
 0x200   :  { %v666_v55 = vmul.f32 %v899_v3, %v665_v16 }
 0x202   :  { %v667_v28 = vmul.f32 0.5, %v666_v55 }
 0x204   :  { %v668_v31 = vsub.f32 1.5, %v667_v28 }
 0x206   :  { %v669_v12 = vmul.f32 %v899_v3, %v668_v31 }
 0x208   :  { %v673_v36 = vsel %vm672_vm6, %v899_v3, %v669_v12 }
 0x209   :  { %v676_v63 = vmul.f32 %v673_v36, %v659_v34  ;;  %v677_v42 = vmul.f32 %v673_v36, %v660_v4  ;;  %v678_v30 = vmul.f32 %v673_v36, %v661_v35  ;;  %v679_v40 = vmul.f32 %v673_v36, %v662_v0 }
 0x20a   :  { %v675_v21 = vmul.f32 %v673_v36, %v658_v9  ;;  %v674_v37 = vmul.f32 %v673_v36, %v657_v43 }
 0x20b   :  { %v706_v53 = vmul.f32 %v690_v49, %v676_v63  ;;  %v707_v33 = vmul.f32 %v694_v5, %v677_v42  ;;  %v708_v54 = vmul.f32 %v698_v6, %v678_v30  ;;  %v709_v29 = vmul.f32 %v702_v11, %v679_v40 }
 0x20c   :  { %v705_v52 = vmul.f32 %v686_v14, %v675_v21  ;;  %v704_v56 = vmul.f32 %v1401_v41, %v674_v37 }
 0x20d   :  { %v736_v47 = vadd.f32 %v720_v27, %v706_v53  ;;  %v737_v58 = vadd.f32 %v724_v44, %v707_v33  ;;  %v738_v24 = vadd.f32 %v728_v18, %v708_v54  ;;  %v739_v2 = vadd.f32 %v732_v38, %v709_v29  ;;  %v803_v44 = vpop.permute.xlu2 %802 }
 0x20e   :  { %v735_v39 = vadd.f32 %v716_v23, %v705_v52  ;;  %v734_v19 = vadd.f32 %v712_v22, %v704_v56 }
 0x20f   :  { %v742_v46 = vmax.f32 %v736_v47, 0.0  ;;  %v743_v15 = vmax.f32 %v737_v58, 0.0  ;;  %v744_v17 = vmax.f32 %v738_v24, 0.0  ;;  %v745_v41 = vmax.f32 %v739_v2, 0.0 }
 0x210   :  { %v740_v59 = vmax.f32 %v734_v19, 0.0  ;;  %v741_v25 = vmax.f32 %v735_v39, 0.0 }
 0x211   :  { %v785_v6 = vmul.f32 %v766_v60, %v742_v46  ;;  %v786_v32 = vmul.f32 %v771_v57, %v743_v15  ;;  %v787_v10 = vmul.f32 %v776_v61, %v744_v17  ;;  %v788_v45 = vmul.f32 %v781_v8, %v745_v41 }
 0x212   :  { %v783_v49 = vmul.f32 %v756_v7, %v740_v59  ;;  %v784_v5 = vmul.f32 %v761_v48, %v741_v25 }
 0x214   :  { %v789_v51 = vadd.f32 %v784_v5, %v783_v49 }
 0x216   :  { %v790_v50 = vadd.f32 %v789_v51, %v785_v6 }
 0x218   :  { %v791_v11 = vadd.f32 %v790_v50, %v786_v32 }
 0x21a   :  { %v792_v13 = vadd.f32 %v791_v11, %v787_v10 }
 0x21c   :  { %v793_v20 = vadd.f32 %v792_v13, %v788_v45 }
 0x21e   :  { %v794_v62 = vrot.slane %v793_v20, 4 }
 0x220   :  { %v795_v23 = vadd.f32 %v794_v62, %v793_v20 }
 0x222   :  { %v796_v1 = vrot.slane %v795_v23, 2 }
 0x224   :  { %v797_v26 = vadd.f32 %v796_v1, %v795_v23 }
 0x226   :  { %v798_v27 = vrot.slane %v797_v26, 1 }
 0x228   :  { %v799_v14 = vadd.f32 %v798_v27, %v797_v26 }
 0x22a   :  { %v805_v3 = vadd.f32 %v803_v44, %v799_v14 }
 0x22c   :  { %900 = vtanh.f32 %v805_v3 }
 0x232   :  { %v901_v16 = vpop.eup %900 }
 0x233   :  { %807 = vst [vmem:[%s1420_s5] sm:$0x1] %v901_v16 }

</bundles_post_ra>
